<compile_context>
chip_gen: v7x
topology: tpu7x:2x2x1
jax: 0.10.0
libtpu: 0.0.40
codegen_flags: <defaults>
</compile_context>

<pallas_src>
import jax
import jax.numpy as jnp
from jax.experimental import pallas as pl
from jax.experimental.pallas import tpu as pltpu

BN_EPS = 1e-5
LEAKY_SLOPE = 0.1
_MiB = 1024 * 1024


def _round_up(x, m):
    return ((x + m - 1) // m) * m


def _padded_bytes(rows, cols, itemsize):
    """Approximate VMEM footprint of a 2-D tile after (sublane, lane) padding."""
    return _round_up(max(rows, 1), 8) * _round_up(max(cols, 1), 128) * itemsize


def _vmem_config():
    """Per-generation (physical_vmem, vmem_limit, x_block_budget, two_tc)."""
    cap = None
    try:
        info = pltpu.get_tpu_info()
        for name in ("vmem_capacity_bytes", "vmem_size_bytes", "vmem_bytes"):
            cap = getattr(info, name, None)
            if cap:
                break
    except Exception:
        cap = None
    if not cap:
        cap = 64 * _MiB                          # assume the tightest (v7x per-TC)
    if cap >= 100 * _MiB:
        # v5e / v6e: 128 MiB physical VMEM -> large double-buffered x blocks.
        return cap, 64 * _MiB, 32 * _MiB, False
    # v7x: 64 MiB per TensorCore, 2 TCs; keep well under physical VMEM.
    return cap, 44 * _MiB, 20 * _MiB, True


def _fixed_vmem_bytes(b_tile, C, n_pad):
    """Weights (double-buffered f32), output block (double-buffered), f32 acc."""
    weights = 2 * (_padded_bytes(C, C, 4) + _padded_bytes(1, C, 4)
                   + _padded_bytes(C, n_pad, 4) + _padded_bytes(1, n_pad, 4))
    return (weights + 2 * _padded_bytes(b_tile, n_pad, 4)
            + _padded_bytes(b_tile, C, 4))


def _x_vmem_bytes(b_tile, lanes, C, itemsize):
    """Double-buffered x block [b_tile, C, lanes] in the input dtype."""
    return 2 * b_tile * _padded_bytes(C, lanes, itemsize)


def _choose_tiles(B, C, HW, itemsize, n_pad, x_budget, vmem_limit, two_tc):
    """Pick (b_tile, s_tile) so x blocks + weights + output + acc fit VMEM."""
    margin = 2 * _MiB

    b_tile = min(128, _round_up(B, 8))
    while b_tile > 8 and (
        _x_vmem_bytes(b_tile, 128, C, itemsize) > x_budget
        or (_fixed_vmem_bytes(b_tile, C, n_pad)
            + _x_vmem_bytes(b_tile, 128, C, itemsize) + margin) > vmem_limit
    ):
        b_tile = _round_up(b_tile // 2, 8)

    # Keep >= 2 blocks on the "parallel" batch axis on v7x so both TensorCores
    # get work during the HBM-bound pooling loop.
    # TODO(synk): when B <= 8 on v7x, split the spatial reduction across the
    # two cores and combine partial sums instead of idling one core.
    if two_tc and B > 8:
        b_tile = min(b_tile, _round_up((B + 1) // 2, 8))

    avail = min(x_budget, vmem_limit - margin - _fixed_vmem_bytes(b_tile, C, n_pad))
    chunk128 = _x_vmem_bytes(b_tile, 128, C, itemsize)
    n128 = max(avail, 0) // chunk128
    s_tile = max(128, n128 * 128)
    if HW <= s_tile:
        s_tile = HW                    # single spatial block == full extent
    return b_tile, s_tile


def _make_kernel(HW, s_tile):
    """Kernel factory; HW / s_tile are static (ragged-tail mask is compile-time)."""
    hw_rem = HW % s_tile if s_tile < HW else 0   # size of the ragged spatial tail

    def kernel(x_ref, w1_ref, b1_ref, w2_ref, b2_ref, out_ref, acc_ref):
        s = pl.program_id(1)
        last = pl.num_programs(1) - 1

        @pl.when(s == 0)
        def _init():
            acc_ref[...] = jnp.zeros_like(acc_ref)

        # Sum-pool this spatial chunk; accumulate in f32 (upcast after load so
        # the HBM stream stays in the input dtype).
        if hw_rem:
            @pl.when(s != last)
            def _full_chunk():
                acc_ref[...] += jnp.sum(x_ref[...].astype(jnp.float32), axis=-1)

            @pl.when(s == last)
            def _tail_chunk():
                # Ragged tail: out-of-bounds lane contents are undefined on TPU,
                # so zero them before accumulating.
                x = x_ref[...].astype(jnp.float32)
                lane = jax.lax.broadcasted_iota(jnp.int32, x.shape, 2)
                x = jnp.where(lane < hw_rem, x, 0.0)
                acc_ref[...] += jnp.sum(x, axis=-1)
        else:
            acc_ref[...] += jnp.sum(x_ref[...].astype(jnp.float32), axis=-1)

        @pl.when(s == last)
        def _finalize():
            # conv1x1 (no bias) + eval-mode BatchNorm + the 1/(H*W) mean factor
            # are folded into w1 / b1 by the wrapper.
            y = jnp.dot(acc_ref[...], w1_ref[...],
                        preferred_element_type=jnp.float32) + b1_ref[...]
            y = jnp.where(y >= 0, y, LEAKY_SLOPE * y)            # LeakyReLU(0.1)
            out = jnp.dot(y, w2_ref[...],
                          preferred_element_type=jnp.float32) + b2_ref[...]
            out_ref[...] = out.astype(out_ref.dtype)

    return kernel


def init_params(key, in_channels, num_classes):
    k_conv, k_fc_w, k_fc_b = jax.random.split(key, 3)
    # Conv2d weight [C_out, C_in, 1, 1], kaiming normal, mode='fan_out', relu:
    # std = sqrt(2 / fan_out), fan_out = C_out * kH * kW = in_channels.
    wconv = jax.random.normal(k_conv, (in_channels, in_channels, 1, 1),
                              jnp.float32) * jnp.sqrt(2.0 / in_channels)
    # BatchNorm2d: weight=1, bias=0, running_mean=0, running_var=1.
    gamma = jnp.ones((in_channels,), jnp.float32)
    beta = jnp.zeros((in_channels,), jnp.float32)
    running_mean = jnp.zeros((in_channels,), jnp.float32)
    running_var = jnp.ones((in_channels,), jnp.float32)
    # Linear default PyTorch init: U(-1/sqrt(fan_in), 1/sqrt(fan_in)).
    bound = 1.0 / jnp.sqrt(in_channels)
    wfc = jax.random.uniform(k_fc_w, (num_classes, in_channels), jnp.float32,
                             -bound, bound)
    bfc = jax.random.uniform(k_fc_b, (num_classes,), jnp.float32, -bound, bound)
    return dict(wconv=wconv, gamma=gamma, beta=beta,
                running_mean=running_mean, running_var=running_var,
                wfc=wfc, bfc=bfc)


def proxynet_forward(x, params, *, _force_b_tile=None, _force_s_tile=None):
    B, C, H, W = x.shape
    HW = H * W
    num_classes = params["wfc"].shape[0]
    itemsize = jnp.dtype(x.dtype).itemsize
    n_pad = _round_up(num_classes, 128)            # lane-dense output slab

    vmem_cap, vmem_limit, x_budget, two_tc = _vmem_config()
    b_tile, s_tile = _choose_tiles(B, C, HW, itemsize, n_pad,
                                   x_budget, vmem_limit, two_tc)
    if _force_b_tile is not None:                  # testing hooks
        b_tile = _force_b_tile
    if _force_s_tile is not None:
        s_tile = HW if HW <= _force_s_tile else _force_s_tile

    n_b = pl.cdiv(B, b_tile)
    n_s = pl.cdiv(HW, s_tile)
    b_out = n_b * b_tile                           # output rows incl. ragged tail

    # TODO(synk): for very wide channels (C in the thousands) keep w1/w2 in
    # bf16 and/or tile the epilogue's C_out dimension to bound weight VMEM.
    required = (_fixed_vmem_bytes(b_tile, C, n_pad)
                + _x_vmem_bytes(b_tile, s_tile, C, itemsize) + 2 * _MiB)
    vmem_limit = min(max(vmem_limit, required), vmem_cap)

    # ---- parameter folding (trace-time JAX, outside the kernel) ----
    scale = params["gamma"] * jax.lax.rsqrt(
        params["running_var"].astype(jnp.float32) + BN_EPS)       # [C]
    shift = params["beta"] - params["running_mean"] * scale       # [C]
    # pooled mean == (sum over HW) / HW; fold 1/HW and BN scale into the conv.
    w1 = (params["wconv"].reshape(C, C).T.astype(jnp.float32)
          * (scale / HW)[None, :])                                # [C_in, C_out]
    b1 = shift.reshape(1, C).astype(jnp.float32)                  # [1, C]
    w2 = jnp.zeros((C, n_pad), jnp.float32).at[:, :num_classes].set(
        params["wfc"].T.astype(jnp.float32))                      # [C, n_pad]
    b2 = jnp.zeros((1, n_pad), jnp.float32).at[:, :num_classes].set(
        params["bfc"].astype(jnp.float32))                        # [1, n_pad]

    # x streamed un-padded in its native dtype; no extra HBM pass over x.
    x_flat = x.reshape(B, C, HW)

    flops = B * C * HW + 2 * B * C * (C + num_classes)
    bytes_accessed = (B * C * HW * itemsize
                      + (w1.size + b1.size + w2.size + b2.size) * 4
                      + B * num_classes * 4)

    out = pl.pallas_call(
        _make_kernel(HW, s_tile),
        out_shape=jax.ShapeDtypeStruct((b_out, n_pad), jnp.float32),
        grid_spec=pltpu.PrefetchScalarGridSpec(
            num_scalar_prefetch=0,
            grid=(n_b, n_s),
            in_specs=[
                # TODO(synk): sweep pipeline_mode=pl.Buffered(3) on x when the
                # per-step block ends up small (tiny HW, many batch tiles).
                pl.BlockSpec((b_tile, C, s_tile), lambda i, s: (i, 0, s)),
                pl.BlockSpec((C, C), lambda i, s: (0, 0)),
                pl.BlockSpec((1, C), lambda i, s: (0, 0)),
                pl.BlockSpec((C, n_pad), lambda i, s: (0, 0)),
                pl.BlockSpec((1, n_pad), lambda i, s: (0, 0)),
            ],
            out_specs=pl.BlockSpec((b_tile, n_pad), lambda i, s: (i, 0)),
            scratch_shapes=[pltpu.VMEM((b_tile, C), jnp.float32)],
        ),
        compiler_params=pltpu.CompilerParams(
            dimension_semantics=("parallel", "arbitrary"),
            vmem_limit_bytes=int(vmem_limit)),
        cost_estimate=pl.CostEstimate(
            flops=int(flops), transcendentals=0,
            bytes_accessed=int(bytes_accessed)),
    )(x_flat, w1, b1, w2, b2)

    return out[:B, :num_classes]


def proxynet_reference(x, params):
    """Pure-JAX reference for correctness checking (eval-mode BN)."""
    B, C, H, W = x.shape
    pooled = jnp.mean(x.astype(jnp.float32), axis=(2, 3))           # [B, C]
    y = pooled @ params["wconv"].reshape(C, C).T
    scale = params["gamma"] / jnp.sqrt(params["running_var"] + BN_EPS)
    shift = params["beta"] - params["running_mean"] * scale
    y = y * scale + shift
    y = jnp.where(y >= 0, y, LEAKY_SLOPE * y)
    return y @ params["wfc"].T + params["bfc"]


if __name__ == "__main__":
    key = jax.random.PRNGKey(0)
    k1, k2, k3, k4 = jax.random.split(key, 4)

    # Case 1: tiny shapes, single spatial block, single (ragged) batch tile.
    B, C, H, W, NUM_CLASSES = 2, 32, 8, 8, 8
    x = jax.random.normal(k1, (B, C, H, W), jnp.float32)
    params = init_params(k2, C, NUM_CLASSES)
    out = jax.block_until_ready(proxynet_forward(x, params))
    ref = proxynet_reference(x, params)
    assert out.shape == (B, NUM_CLASSES)
    assert jnp.allclose(out, ref, atol=1e-4, rtol=1e-4), "case 1 mismatch"

    # Case 2: ragged spatial tail + ragged batch tail (exercises the in-kernel
    # tail mask and the cdiv grid) by forcing small tiles.
    B2, C2, H2, W2, NC2 = 10, 32, 18, 18, 28     # HW = 324 -> chunks 128,128,68
    x2 = jax.random.normal(k3, (B2, C2, H2, W2), jnp.float32)
    params2 = init_params(k4, C2, NC2)
    out2 = jax.block_until_ready(
        proxynet_forward(x2, params2, _force_b_tile=8, _force_s_tile=128))
    ref2 = proxynet_reference(x2, params2)
    assert out2.shape == (B2, NC2)
    assert jnp.allclose(out2, ref2, atol=1e-4, rtol=1e-4), "case 2 mismatch"

    print("KERNEL_OK")
</pallas_src>

<mosaic_0001>
module attributes {stable_mosaic.version = 11 : i64} {
  func.func @kernel(%arg0: i32, %arg1: i32, %arg2: memref<8x32x64xf32, #tpu.memory_space<vmem>>, %arg3: memref<32x32xf32, #tpu.memory_space<vmem>>, %arg4: memref<1x32xf32, #tpu.memory_space<vmem>>, %arg5: memref<32x128xf32, #tpu.memory_space<vmem>>, %arg6: memref<1x128xf32, #tpu.memory_space<vmem>>, %arg7: memref<8x128xf32, #tpu.memory_space<vmem>>, %arg8: memref<8x32xf32, #tpu.memory_space<vmem>>) attributes {dimension_semantics = [#tpu.dimension_semantics<parallel>, #tpu.dimension_semantics<arbitrary>], iteration_bounds = array<i64: 1, 1>, scalar_prefetch = 0 : i64, scratch_operands = 1 : i64, tpu.core_type = #tpu.core_type<tc>, window_params = [{transform_indices = @transform_0, window_bounds = array<i64: 8, 32, 64>}, {pipeline_mode = #tpu.pipeline_mode<synchronous>, transform_indices = @transform_1, window_bounds = array<i64: 32, 32>}, {pipeline_mode = #tpu.pipeline_mode<synchronous>, transform_indices = @transform_2, window_bounds = array<i64: 1, 32>}, {pipeline_mode = #tpu.pipeline_mode<synchronous>, transform_indices = @transform_3, window_bounds = array<i64: 32, 128>}, {pipeline_mode = #tpu.pipeline_mode<synchronous>, transform_indices = @transform_4, window_bounds = array<i64: 1, 128>}, {transform_indices = @transform_5, window_bounds = array<i64: 8, 128>}]} {
    %c0_i32 = arith.constant 0 : i32
    %0 = arith.cmpi eq, %arg1, %c0_i32 : i32
    %1 = arith.extui %0 : i1 to i32
    %c0_i32_0 = arith.constant 0 : i32
    %2 = arith.cmpi ne, %1, %c0_i32_0 : i32
    scf.if %2 {
      %cst_9 = arith.constant 0.000000e+00 : f32
      %11 = vector.broadcast %cst_9 : f32 to vector<8x32xf32>
      %c0_10 = arith.constant 0 : index
      %c0_11 = arith.constant 0 : index
      %12 = vector.load %arg8[%c0_10, %c0_11] : memref<8x32xf32, #tpu.memory_space<vmem>>, vector<8x32xf32>
      tpu.vector_store %arg8[%c0_10, %c0_11], %11 {strides = array<i32>} : memref<8x32xf32, #tpu.memory_space<vmem>>, vector<8x32xf32>,
    } else {
    }
    %c0 = arith.constant 0 : index
    %c0_1 = arith.constant 0 : index
    %3 = vector.load %arg8[%c0, %c0_1] : memref<8x32xf32, #tpu.memory_space<vmem>>, vector<8x32xf32>
    %c0_2 = arith.constant 0 : index
    %c0_3 = arith.constant 0 : index
    %c0_4 = arith.constant 0 : index
    %4 = vector.load %arg2[%c0_2, %c0_3, %c0_4] : memref<8x32x64xf32, #tpu.memory_space<vmem>>, vector<8x32x64xf32>
    %cst = arith.constant dense<0.000000e+00> : vector<8x32xf32>
    %5 = vector.multi_reduction <add>, %4, %cst [2] : vector<8x32x64xf32> to vector<8x32xf32>
    %6 = arith.addf %3, %5 : vector<8x32xf32>
    %c0_5 = arith.constant 0 : index
    %c0_6 = arith.constant 0 : index
    %7 = vector.load %arg8[%c0_5, %c0_6] : memref<8x32xf32, #tpu.memory_space<vmem>>, vector<8x32xf32>
    tpu.vector_store %arg8[%c0_5, %c0_6], %6 {strides = array<i32>} : memref<8x32xf32, #tpu.memory_space<vmem>>, vector<8x32xf32>,
    %c0_i32_7 = arith.constant 0 : i32
    %8 = arith.cmpi eq, %arg1, %c0_i32_7 : i32
    %9 = arith.extui %8 : i1 to i32
    %c0_i32_8 = arith.constant 0 : i32
    %10 = arith.cmpi ne, %9, %c0_i32_8 : i32
    scf.if %10 {
      %c0_9 = arith.constant 0 : index
      %c0_10 = arith.constant 0 : index
      %11 = vector.load %arg8[%c0_9, %c0_10] : memref<8x32xf32, #tpu.memory_space<vmem>>, vector<8x32xf32>
      %c0_11 = arith.constant 0 : index
      %c0_12 = arith.constant 0 : index
      %12 = vector.load %arg3[%c0_11, %c0_12] : memref<32x32xf32, #tpu.memory_space<vmem>>, vector<32x32xf32>
      %cst_13 = arith.constant dense<0.000000e+00> : vector<8x32xf32>
      %13 = tpu.matmul %11, %12, %cst_13 {dimension_numbers = #tpu.dot_dimension_numbers<[1], [0], [0], [1], [0, 0, 1, 1], [], []>} : vector<8x32xf32>, vector<32x32xf32>, vector<8x32xf32> -> vector<8x32xf32>
      %c0_14 = arith.constant 0 : index
      %c0_15 = arith.constant 0 : index
      %14 = vector.load %arg4[%c0_14, %c0_15] : memref<1x32xf32, #tpu.memory_space<vmem>>, vector<1x32xf32>
      %15 = vector.broadcast %14 : vector<1x32xf32> to vector<8x32xf32>
      %16 = arith.addf %13, %15 : vector<8x32xf32>
      %cst_16 = arith.constant 0.000000e+00 : f32
      %17 = vector.broadcast %cst_16 : f32 to vector<8x32xf32>
      %18 = arith.cmpf oge, %16, %17 : vector<8x32xf32>
      %cst_17 = arith.constant 1.000000e-01 : f32
      %19 = vector.broadcast %cst_17 : f32 to vector<8x32xf32>
      %20 = arith.mulf %19, %16 : vector<8x32xf32>
      %21 = arith.select %18, %16, %20 : vector<8x32xi1>, vector<8x32xf32>
      %c0_18 = arith.constant 0 : index
      %c0_19 = arith.constant 0 : index
      %22 = vector.load %arg5[%c0_18, %c0_19] : memref<32x128xf32, #tpu.memory_space<vmem>>, vector<32x128xf32>
      %cst_20 = arith.constant dense<0.000000e+00> : vector<8x128xf32>
      %23 = tpu.matmul %21, %22, %cst_20 {dimension_numbers = #tpu.dot_dimension_numbers<[1], [0], [0], [1], [0, 0, 1, 1], [], []>} : vector<8x32xf32>, vector<32x128xf32>, vector<8x128xf32> -> vector<8x128xf32>
      %c0_21 = arith.constant 0 : index
      %c0_22 = arith.constant 0 : index
      %24 = vector.load %arg6[%c0_21, %c0_22] : memref<1x128xf32, #tpu.memory_space<vmem>>, vector<1x128xf32>
      %25 = vector.broadcast %24 : vector<1x128xf32> to vector<8x128xf32>
      %26 = arith.addf %23, %25 : vector<8x128xf32>
      %c0_23 = arith.constant 0 : index
      %c0_24 = arith.constant 0 : index
      %27 = vector.load %arg7[%c0_23, %c0_24] : memref<8x128xf32, #tpu.memory_space<vmem>>, vector<8x128xf32>
      tpu.vector_store %arg7[%c0_23, %c0_24], %26 {strides = array<i32>} : memref<8x128xf32, #tpu.memory_space<vmem>>, vector<8x128xf32>,
    } else {
    }
    return
  }
  func.func @transform_0(%arg0: i32, %arg1: i32) -> (i32, i32, i32) {
    %c0_i32 = arith.constant 0 : i32
    %c0_i32_0 = arith.constant 0 : i32
    return %arg0, %c0_i32, %arg1 : i32, i32, i32
  }
  func.func @transform_1(%arg0: i32, %arg1: i32) -> (i32, i32) {
    %c0_i32 = arith.constant 0 : i32
    %c0_i32_0 = arith.constant 0 : i32
    %c0_i32_1 = arith.constant 0 : i32
    return %c0_i32, %c0_i32_0 : i32, i32
  }
  func.func @transform_2(%arg0: i32, %arg1: i32) -> (i32, i32) {
    %c0_i32 = arith.constant 0 : i32
    %c0_i32_0 = arith.constant 0 : i32
    %c0_i32_1 = arith.constant 0 : i32
    return %c0_i32, %c0_i32_0 : i32, i32
  }
  func.func @transform_3(%arg0: i32, %arg1: i32) -> (i32, i32) {
    %c0_i32 = arith.constant 0 : i32
    %c0_i32_0 = arith.constant 0 : i32
    %c0_i32_1 = arith.constant 0 : i32
    return %c0_i32, %c0_i32_0 : i32, i32
  }
  func.func @transform_4(%arg0: i32, %arg1: i32) -> (i32, i32) {
    %c0_i32 = arith.constant 0 : i32
    %c0_i32_0 = arith.constant 0 : i32
    %c0_i32_1 = arith.constant 0 : i32
    return %c0_i32, %c0_i32_0 : i32, i32
  }
  func.func @transform_5(%arg0: i32, %arg1: i32) -> (i32, i32) {
    %c0_i32 = arith.constant 0 : i32
    %c0_i32_0 = arith.constant 0 : i32
    return %arg0, %c0_i32 : i32, i32
  }
}

</mosaic_0001>

<bundles_post_ra>
// kernel: tpu_custom_call.1
= control target key start
LH: loop header
LB: loop body
LE: loop exit
PB: predicated region body
PF: predicated region fallthrough
CT: control target
= control target key end

     0   :  { %10 = vsyncpa [#allocation4], 0  ;;  %s1003_s0 = inlined_call_operand.hbm [shape: f32[2,32,64], index: 0, kind: input, shape index: {}]   ;;  %s1004_s1 = inlined_call_operand.hbm [shape: f32[32,32], index: 1, kind: input, shape index: {}]   ;;  %s1005_s2 = inlined_call_operand.vmem [shape: f32[1,32], index: 2, kind: input, shape index: {}]   ;;  %s1006_s3 = inlined_call_operand.hbm [shape: f32[32,128], index: 3, kind: input, shape index: {}]   ;;  %s1007_s4 = inlined_call_operand.vmem [shape: f32[1,128], index: 4, kind: input, shape index: {}]   ;;  %s1008_s5 = inlined_call_operand.hbm [shape: f32[8,128], index: 5, kind: output, shape index: {}]  }
   0x1   :  { %11 = vsyncpa [#allocation7], 0 }
   0x2   :  { %12 = vsyncpa [#allocation5], 0 }
   0x3   :  { %17 = vsyncadd [#allocation4], 3072  ;;  %s751_s18 = smov [#allocation6]   ;;  %s752_s20 = smov [#allocation3]  }
   0x4   :  { %s30_s19 = sshll.u32 %s751_s18, 4  ;;  %s18_s21 = sshll.u32 %s752_s20, 4  ;;  %s31_s19 = int_to_ptr.vmem [resolvable:$true] %s30_s19  ;;  %s790_s21 = int_to_ptr.vmem [resolvable:$true] %s18_s21 }
   0x5   :  { %s657_s24 = scalar_lea.hbm %s1004_s1, 512 }
   0x6   :  { %p658_p0 = scmp.ne.s32.totalorder %s1004_s1, %s657_s24  ;;  %p661_p1 = scmp.lt.u32.totalorder %s657_s24, %s1004_s1 }
   0x8   :  { %p663_p2 = pnand %p661_p1, %p658_p0 }
   0xa   :  { %666 = shalt.err (!%p663_p2)
}
   0xb   :  { %s667_s29 = scalar_lea.vmem %s31_s19, 512  ;;  %p672_p4 = scmp.lt.s32.totalorder %s31_s19, %s31_s19 }
   0xc   :  { %p668_p3 = scmp.ne.s32.totalorder %s31_s19, %s667_s29  ;;  %p673_p5 = scmp.lt.s32.totalorder %s667_s29, %s667_s29 }
   0xe   :  { %p674_p6 = por %p673_p5, %p672_p4 }
  0x10   :  { %p675_p7 = pnand %p674_p6, %p668_p3 }
  0x12   :  { %678 = shalt.err (!%p675_p7)
}
  0x13   :  { %s753_s30 = smov 128   ;;  %s754_s6 = smov 8  }
  0x14   :  { %36 = dma.hbm_to_vmem [thread:$0]  %s1004_s1, 512, %s31_s19, [#allocation7], %s753_s30, %s753_s30, %s754_s6  }
  0x15   :  { %s679_s11 = scalar_lea.hbm %s1003_s0, 1024 }
  0x16   :  { %p680_p8 = scmp.ne.s32.totalorder %s1003_s0, %s679_s11  ;;  %p683_p9 = scmp.lt.u32.totalorder %s679_s11, %s1003_s0 }
  0x18   :  { %p685_p10 = pnand %p683_p9, %p680_p8 }
  0x1a   :  { %688 = shalt.err (!%p685_p10)
}
  0x1b   :  { %s689_s16 = scalar_lea.vmem %s790_s21, 1024  ;;  %s693_s1 = scalar_lea.vmem %s790_s21, 4096 }
  0x1c   :  { %p690_p11 = scmp.ne.s32.totalorder %s790_s21, %s689_s16  ;;  %p694_p12 = scmp.lt.s32.totalorder %s790_s21, %s790_s21 }
  0x1d   :  { %p695_p13 = scmp.lt.s32.totalorder %s693_s1, %s689_s16 }
  0x1f   :  { %p696_p0 = por %p695_p13, %p694_p12 }
  0x21   :  { %p697_p1 = pnand %p696_p0, %p690_p11 }
  0x23   :  { %700 = shalt.err (!%p697_p1)
}
  0x24   :  { %24 = dma.hbm_to_vmem [thread:$0]  %s1003_s0, 1024, %s790_s21, [#allocation4], %s753_s30, %s753_s30, %s754_s6  }
  0x25   :  { %s755_s19 = smov [#allocation8]   ;;  %s701_s24 = scalar_lea.hbm %s1006_s3, 512 }
  0x26   :  { %s44_s20 = sshll.u32 %s755_s19, 4  ;;  %p702_p2 = scmp.ne.s32.totalorder %s1006_s3, %s701_s24  ;;  %s45_s20 = int_to_ptr.vmem [resolvable:$true] %s44_s20 }
  0x27   :  { %p705_p3 = scmp.lt.u32.totalorder %s701_s24, %s1006_s3 }
  0x29   :  { %p707_p4 = pnand %p705_p3, %p702_p2 }
  0x2b   :  { %710 = shalt.err (!%p707_p4)
}
  0x2c   :  { %s711_s29 = scalar_lea.vmem %s45_s20, 512  ;;  %p716_p6 = scmp.lt.s32.totalorder %s45_s20, %s45_s20 }
  0x2d   :  { %p712_p5 = scmp.ne.s32.totalorder %s45_s20, %s711_s29  ;;  %p717_p7 = scmp.lt.s32.totalorder %s711_s29, %s711_s29 }
  0x2f   :  { %p718_p8 = por %p717_p7, %p716_p6 }
  0x31   :  { %p719_p9 = pnand %p718_p8, %p712_p5 }
  0x33   :  { %722 = shalt.err (!%p719_p9)
}
  0x34   :  { %50 = dma.hbm_to_vmem [thread:$0]  %s1006_s3, 512, %s45_s20, [#allocation7], %s753_s30, %s753_s30, %s754_s6  }
  0x35   :  { %745 = dma.done.wait [#allocation4], 4096  }
  0x36   :  { %746 = vsyncadd [#allocation4], 4294963200 }
  0x37   :  { %747 = dma.done.wait [#allocation7], 1024  }
  0x38   :  { %748 = vsyncadd [#allocation7], 4294966272  ;;  %vm101_vm0 = vcmask 523264   ;;  %v73_v0 = vld [vmem:[#allocation3 + $0x20] sm:$0xff]  ;;  %v74_v2 = vld [vmem:[#allocation3 + $0x28] sm:$0xff]  ;;  %vm66_vm1 = vcmask 261120  }
  0x39   :  { %v69_v1 = vld [vmem:[#allocation3] sm:$0xff]  ;;  %v114_v3 = vsel %vm101_vm0, %v73_v0, 0.0  ;;  %v70_v5 = vld [vmem:[#allocation3 + $0x8] sm:$0xff]  ;;  %v117_v6 = vsel %vm101_vm0, %v74_v2, 0.0  ;;  %v75_v8 = vld [vmem:[#allocation3 + $0x30] sm:$0xff]  ;;  %v756_v0 = vmov 0.0  }
  0x3a   :  { %v102_v4 = vsel %vm101_vm0, %v69_v1, 0.0  ;;  %115 = vadd.xlane.f32.xlu1 %v114_v3  ;;  %v105_v7 = vsel %vm101_vm0, %v70_v5, 0.0  ;;  %v71_v9 = vld [vmem:[#allocation3 + $0x10] sm:$0xff]  ;;  %v120_v10 = vsel %vm101_vm0, %v75_v8, 0.0  ;;  %v78_v12 = vld [vmem:[#allocation3 + $0x48] sm:$0xff]  ;;  %v77_v13 = vld [vmem:[#allocation3 + $0x40] sm:$0xff] }
  0x3b   :  { %103 = vadd.xlane.f32.xlu0 %v102_v4  ;;  %v108_v11 = vsel %vm101_vm0, %v71_v9, 0.0  ;;  %v129_v14 = vsel %vm101_vm0, %v78_v12, 0.0  ;;  %v126_v15 = vsel %vm101_vm0, %v77_v13, 0.0  ;;  %v76_v16 = vld [vmem:[#allocation3 + $0x38] sm:$0xff]  ;;  %v81_v20 = vld [vmem:[#allocation3 + $0x60] sm:$0xff]  ;;  %v79_v21 = vld [vmem:[#allocation3 + $0x50] sm:$0xff] }
  0x3c   :  { %v72_v17 = vld [vmem:[#allocation3 + $0x18] sm:$0xff]  ;;  %v123_v18 = vsel %vm101_vm0, %v76_v16, 0.0  ;;  %v138_v22 = vsel %vm101_vm0, %v81_v20, 0.0  ;;  %v132_v23 = vsel %vm101_vm0, %v79_v21, 0.0  ;;  %v82_v25 = vld [vmem:[#allocation3 + $0x68] sm:$0xff]  ;;  %v85_v28 = vld [vmem:[#allocation3 + $0x80] sm:$0xff] }
  0x3d   :  { %v111_v19 = vsel %vm101_vm0, %v72_v17, 0.0  ;;  %v80_v24 = vld [vmem:[#allocation3 + $0x58] sm:$0xff]  ;;  %v141_v27 = vsel %vm101_vm0, %v82_v25, 0.0  ;;  %v83_v29 = vld [vmem:[#allocation3 + $0x70] sm:$0xff]  ;;  %v150_v30 = vsel %vm101_vm0, %v85_v28, 0.0  ;;  %v86_v33 = vld [vmem:[#allocation3 + $0x88] sm:$0xff] }
  0x3e   :  { %118 = vadd.xlane.f32.xlu1 %v117_v6  ;;  %v135_v26 = vsel %vm101_vm0, %v80_v24, 0.0  ;;  %v144_v31 = vsel %vm101_vm0, %v83_v29, 0.0  ;;  %v84_v32 = vld [vmem:[#allocation3 + $0x78] sm:$0xff]  ;;  %v153_v35 = vsel %vm101_vm0, %v86_v33, 0.0  ;;  %v89_v36 = vld [vmem:[#allocation3 + $0xa0] sm:$0xff]  ;;  %v87_v37 = vld [vmem:[#allocation3 + $0x90] sm:$0xff] }
  0x3f   :  { %106 = vadd.xlane.f32.xlu0 %v105_v7  ;;  %v147_v34 = vsel %vm101_vm0, %v84_v32, 0.0  ;;  %v162_v38 = vsel %vm101_vm0, %v89_v36, 0.0  ;;  %v156_v39 = vsel %vm101_vm0, %v87_v37, 0.0  ;;  %v88_v40 = vld [vmem:[#allocation3 + $0x98] sm:$0xff]  ;;  %v90_v41 = vld [vmem:[#allocation3 + $0xa8] sm:$0xff]  ;;  %v93_v44 = vld [vmem:[#allocation3 + $0xc0] sm:$0xff] }
  0x40   :  { %v159_v42 = vsel %vm101_vm0, %v88_v40, 0.0  ;;  %v165_v43 = vsel %vm101_vm0, %v90_v41, 0.0  ;;  %v91_v45 = vld [vmem:[#allocation3 + $0xb0] sm:$0xff]  ;;  %v174_v46 = vsel %vm101_vm0, %v93_v44, 0.0  ;;  %v92_v48 = vld [vmem:[#allocation3 + $0xb8] sm:$0xff]  ;;  %v94_v49 = vld [vmem:[#allocation3 + $0xc8] sm:$0xff] }
  0x41   :  { %v168_v47 = vsel %vm101_vm0, %v91_v45, 0.0  ;;  %v171_v50 = vsel %vm101_vm0, %v92_v48, 0.0  ;;  %v177_v51 = vsel %vm101_vm0, %v94_v49, 0.0  ;;  %v97_v52 = vld [vmem:[#allocation3 + $0xe0] sm:$0xff]  ;;  %v95_v53 = vld [vmem:[#allocation3 + $0xd0] sm:$0xff]  ;;  %v96_v56 = vld [vmem:[#allocation3 + $0xd8] sm:$0xff] }
  0x42   :  { %121 = vadd.xlane.f32.xlu1 %v120_v10  ;;  %v186_v54 = vsel %vm101_vm0, %v97_v52, 0.0  ;;  %v180_v55 = vsel %vm101_vm0, %v95_v53, 0.0  ;;  %v98_v57 = vld [vmem:[#allocation3 + $0xe8] sm:$0xff]  ;;  %v183_v58 = vsel %vm101_vm0, %v96_v56, 0.0  ;;  %v99_v60 = vld [vmem:[#allocation3 + $0xf0] sm:$0xff]  ;;  %v100_v61 = vld [vmem:[#allocation3 + $0xf8] sm:$0xff] }
  0x43   :  { %109 = vadd.xlane.f32.xlu0 %v108_v11  ;;  %v189_v59 = vsel %vm101_vm0, %v98_v57, 0.0  ;;  %v192_v62 = vsel %vm101_vm0, %v99_v60, 0.0  ;;  %v195_v63 = vsel %vm101_vm0, %v100_v61, 0.0  ;;  %67 = vst.msk [vmem:[#allocation2] sm:$0xff] %vm66_vm1, %v756_v0  ;;  %v412_v1 = vld [vmem:[#allocation6] sm:$0xff]  ;;  %v413_v2 = vld [vmem:[#allocation6 + $0x8] sm:$0xff] }
  0x44   :  { %v414_v3 = vld [vmem:[#allocation6 + $0x10] sm:$0xff]  ;;  %v757_v4 = vmov 0.0|0.0   ;;  %v637_v5 = vpack.c.bf16 %v413_v2, %v412_v1  ;;  %v415_v6 = vld [vmem:[#allocation6 + $0x18] sm:$0xff]  ;;  %vm758_vm2 = vmmov 0   ;;  %v499_v8 = vld [vmem:[#allocation8] sm:$0xff]  ;;  %vm241_vm3 = vcmask 130112  }
  0x45   :  { %636 = vmatprep.subr.bf16.mxu0 %v757_v4  ;;  %622 = vmatprep.mubr.msk.f32.mxu0 %vm758_vm2, %v756_v0  ;;  %v640_v7 = vpack.c.bf16 %v415_v6, %v414_v3  ;;  %v500_v9 = vld [vmem:[#allocation8 + $0x8] sm:$0xff]  ;;  %vm248_vm4 = vcmask 195712   ;;  %vm255_vm5 = vcmask 261312   ;;  %vm390_vm6 = vcmask 1041409   ;;  %s759_s8 = smov [#allocation9]  }
  0x46   :  { %130 = vadd.xlane.f32.xlu1 %v129_v14  ;;  %642 = vmatprep.subr.bf16.mxu1 %v757_v4  ;;  %v643_v10 = vpack.c.bf16 %v500_v9, %v499_v8  ;;  %vm392_vm7 = vcmask 1042434   ;;  %vm394_vm8 = vcmask 1043459   ;;  %vm396_vm9 = vcmask 1044484   ;;  %s590_s9 = sshll.u32 %s759_s8, 4  ;;  %s591_s9 = int_to_ptr.vmem [resolvable:$true] %s590_s9 }
  0x47   :  { %127 = vadd.xlane.f32.xlu0 %v126_v15  ;;  %633 = vmatprep.mubr.msk.f32.mxu1 %vm758_vm2, %v756_v0  ;;  %vm398_vm10 = vcmask 1045509   ;;  %vm400_vm11 = vcmask 1046534   ;;  %vm402_vm12 = vcmask 1047559   ;;  %p728_p11 = scmp.lt.s32.totalorder %s591_s9, %s591_s9 }
  0x48   :  { %638 = vmatpush3.bf16.msra.mxu0 %v637_v5  ;;  %644 = vmatpush3.bf16.msra.mxu1 %v643_v10 }
  0x49   :  { %639 = vmatprep.subr.bf16.mxu0 %v757_v4  ;;  %645 = vmatprep.subr.bf16.mxu1 %v757_v4 }
  0x4a   :  { %124 = vadd.xlane.f32.xlu1 %v123_v18 }
  0x4b   :  { %112 = vadd.xlane.f32.xlu0 %v111_v19 }
  0x4c   :  { %641 = vmatpush3.bf16.msra.mxu0 %v640_v7 }
  0x4e   :  { %139 = vadd.xlane.f32.xlu1 %v138_v22 }
  0x4f   :  { %133 = vadd.xlane.f32.xlu0 %v132_v23 }
  0x52   :  { %136 = vadd.xlane.f32.xlu1 %v135_v26 }
  0x53   :  { %142 = vadd.xlane.f32.xlu0 %v141_v27  ;;  %v230_v27 = vlaneseq }
  0x56   :  { %151 = vadd.xlane.f32.xlu1 %v150_v30  ;;  %v231_v30 = vand.u32 127, %v230_v27 }
  0x57   :  { %145 = vadd.xlane.f32.xlu0 %v144_v31 }
  0x58   :  { %v236_v33 = vadd.s32 4294967288, %v231_v30  ;;  %v250_v36 = vadd.s32 4294967272, %v231_v30 }
  0x5a   :  { %148 = vadd.xlane.f32.xlu1 %v147_v34  ;;  %v233_v34 = vshrl.u32 %v230_v27, 7 }
  0x5b   :  { %154 = vadd.xlane.f32.xlu0 %v153_v35  ;;  %v243_v35 = vadd.s32 4294967280, %v231_v30 }
  0x5c   :  { %v898_v40 = vsub.s32 %v231_v30, %v233_v34 }
  0x5d   :  { %v900_v41 = vsub.s32 %v243_v35, %v233_v34 }
  0x5e   :  { %163 = vadd.xlane.f32.xlu1 %v162_v38 }
  0x5f   :  { %157 = vadd.xlane.f32.xlu0 %v156_v39  ;;  %v896_v39 = vsub.s32 %v236_v33, %v233_v34 }
  0x62   :  { %160 = vadd.xlane.f32.xlu1 %v159_v42  ;;  %v902_v42 = vsub.s32 %v250_v36, %v233_v34 }
  0x63   :  { %166 = vadd.xlane.f32.xlu0 %v165_v43 }
  0x66   :  { %175 = vadd.xlane.f32.xlu1 %v174_v46 }
  0x67   :  { %169 = vadd.xlane.f32.xlu0 %v168_v47 }
  0x6a   :  { %172 = vadd.xlane.f32.xlu1 %v171_v50 }
  0x6b   :  { %178 = vadd.xlane.f32.xlu0 %v177_v51 }
  0x6e   :  { %187 = vadd.xlane.f32.xlu1 %v186_v54 }
  0x6f   :  { %181 = vadd.xlane.f32.xlu0 %v180_v55 }
  0x72   :  { %184 = vadd.xlane.f32.xlu1 %v183_v58 }
  0x73   :  { %190 = vadd.xlane.f32.xlu0 %v189_v59 }
  0x76   :  { %196 = vadd.xlane.f32.xlu1 %v195_v63 }
  0x77   :  { %193 = vadd.xlane.f32.xlu0 %v192_v62 }
  0xc7   :  { %v116_v11 = vpop.xlane.xlu1 %115 }
  0xc8   :  { %v104_v12 = vpop.xlane.xlu0 %103  ;;  %v260_v47 = vrot.slane %v116_v11, %v898_v40 }
  0xc9   :  { %v235_v48 = vrot.slane %v104_v12, %v898_v40 }
  0xcb   :  { %v119_v13 = vpop.xlane.xlu1 %118 }
  0xcc   :  { %v107_v14 = vpop.xlane.xlu0 %106  ;;  %v264_v45 = vrot.slane %v119_v13, %v896_v39 }
  0xcd   :  { %v240_v46 = vrot.slane %v107_v14, %v896_v39 }
  0xce   :  { %v265_v58 = vsel %vm241_vm3, %v264_v45, %v260_v47 }
  0xcf   :  { %v122_v15 = vpop.xlane.xlu1 %121  ;;  %v242_v59 = vsel %vm241_vm3, %v240_v46, %v235_v48 }
  0xd0   :  { %v110_v16 = vpop.xlane.xlu0 %109  ;;  %v269_v49 = vrot.slane %v122_v15, %v900_v41 }
  0xd1   :  { %v247_v50 = vrot.slane %v110_v16, %v900_v41 }
  0xd2   :  { %v270_v61 = vsel %vm248_vm4, %v269_v49, %v265_v58  ;;  %v600_v58 = vld [vmem:[%s1005_s2] ss:$0 sm:$0xff]  ;;  %s723_s2 = scalar_lea.vmem %s591_s9, 128 }
  0xd3   :  { %v131_v17 = vpop.xlane.xlu1 %130  ;;  %v249_v62 = vsel %vm248_vm4, %v247_v50, %v242_v59  ;;  %p724_p10 = scmp.ne.s32.totalorder %s591_s9, %s723_s2  ;;  %p729_p12 = scmp.lt.s32.totalorder %s723_s2, %s723_s2 }
  0xd4   :  { %v128_v18 = vpop.xlane.xlu0 %127  ;;  %v283_v51 = vrot.slane %v131_v17, %v896_v39 }
  0xd5   :  { %v279_v52 = vrot.slane %v128_v18, %v898_v40  ;;  %p730_p13 = por %p729_p12, %p728_p11 }
  0xd7   :  { %v125_v19 = vpop.xlane.xlu1 %124  ;;  %v284_v63 = vsel %vm241_vm3, %v283_v51, %v279_v52  ;;  %v68_v51 = vld [vmem:[#allocation2] sm:$0xff]  ;;  %p731_p0 = pnand %p730_p13, %p724_p10 }
  0xd8   :  { %v113_v20 = vpop.xlane.xlu0 %112  ;;  %v274_v53 = vrot.slane %v125_v19, %v902_v42 }
  0xd9   :  { %v254_v54 = vrot.slane %v113_v20, %v902_v42 }
  0xda   :  { %v275_v0 = vsel %vm255_vm5, %v274_v53, %v270_v61 }
  0xdb   :  { %v876_v21 = vpop.xlane.xlu1 %139  ;;  %v256_v1 = vsel %vm255_vm5, %v254_v54, %v249_v62 }
  0xdc   :  { %v134_v22 = vpop.xlane.xlu0 %133  ;;  %v298_v5 = vrot.slane %v876_v21, %v898_v40 }
  0xdd   :  { %v288_v57 = vrot.slane %v134_v22, %v900_v41 }
  0xdf   :  { %v137_v23 = vpop.xlane.xlu1 %136  ;;  %v289_v6 = vsel %vm248_vm4, %v288_v57, %v284_v63 }
  0xe0   :  { %v878_v24 = vpop.xlane.xlu0 %142  ;;  %v293_v60 = vrot.slane %v137_v23, %v902_v42 }
  0xe1   :  { %v302_v2 = vrot.slane %v878_v24, %v896_v39 }
  0xe2   :  { %v294_v9 = vsel %vm255_vm5, %v293_v60, %v289_v6 }
  0xe3   :  { %v880_v25 = vpop.xlane.xlu1 %151  ;;  %v303_v17 = vsel %vm241_vm3, %v302_v2, %v298_v5 }
  0xe4   :  { %v882_v26 = vpop.xlane.xlu0 %145  ;;  %v317_v13 = vrot.slane %v880_v25, %v898_v40 }
  0xe5   :  { %v307_v7 = vrot.slane %v882_v26, %v900_v41 }
  0xe7   :  { %v884_v28 = vpop.xlane.xlu1 %148  ;;  %v308_v23 = vsel %vm248_vm4, %v307_v7, %v303_v17 }
  0xe8   :  { %v886_v29 = vpop.xlane.xlu0 %154  ;;  %v312_v10 = vrot.slane %v884_v28, %v902_v42 }
  0xe9   :  { %v321_v8 = vrot.slane %v886_v29, %v896_v39 }
  0xea   :  { %v313_v27 = vsel %vm255_vm5, %v312_v10, %v308_v23 }
  0xeb   :  { %v888_v31 = vpop.xlane.xlu1 %163  ;;  %v322_v24 = vsel %vm241_vm3, %v321_v8, %v317_v13 }
  0xec   :  { %v890_v32 = vpop.xlane.xlu0 %157  ;;  %v336_v18 = vrot.slane %v888_v31, %v898_v40  ;;  %v391_v31 = vsel %vm390_vm6, %v275_v0, %v256_v1  ;;  %v602_v0 = vld [vmem:[%s1007_s4] ss:$0 sm:$0xff] }
  0xed   :  { %v326_v11 = vrot.slane %v890_v32, %v900_v41  ;;  %v393_v35 = vsel %vm392_vm7, %v294_v9, %v391_v31 }
  0xef   :  { %v892_v37 = vpop.xlane.xlu1 %160  ;;  %v327_v28 = vsel %vm248_vm4, %v326_v11, %v322_v24 }
  0xf0   :  { %v894_v38 = vpop.xlane.xlu0 %166  ;;  %v331_v14 = vrot.slane %v892_v37, %v902_v42 }
  0xf1   :  { %v340_v12 = vrot.slane %v894_v38, %v896_v39 }
  0xf2   :  { %v332_v32 = vsel %vm255_vm5, %v331_v14, %v327_v28 }
  0xf3   :  { %v904_v43 = vpop.xlane.xlu1 %175  ;;  %v341_v29 = vsel %vm241_vm3, %v340_v12, %v336_v18 }
  0xf4   :  { %v906_v44 = vpop.xlane.xlu0 %169  ;;  %v355_v25 = vrot.slane %v904_v43, %v898_v40 }
  0xf5   :  { %v345_v15 = vrot.slane %v906_v44, %v900_v41 }
  0xf7   :  { %v173_v55 = vpop.xlane.xlu1 %172  ;;  %v346_v33 = vsel %vm248_vm4, %v345_v15, %v341_v29 }
  0xf8   :  { %v179_v56 = vpop.xlane.xlu0 %178  ;;  %v350_v19 = vrot.slane %v173_v55, %v902_v42 }
  0xf9   :  { %v359_v16 = vrot.slane %v179_v56, %v896_v39  ;;  %v502_v56 = vld [vmem:[#allocation8 + $0x18] sm:$0xff] }
  0xfa   :  { %v351_v36 = vsel %vm255_vm5, %v350_v19, %v346_v33 }
  0xfb   :  { %v188_v3 = vpop.xlane.xlu1 %187  ;;  %v360_v34 = vsel %vm241_vm3, %v359_v16, %v355_v25 }
  0xfc   :  { %v182_v4 = vpop.xlane.xlu0 %181  ;;  %v374_v37 = vrot.slane %v188_v3, %v898_v40 }
  0xfd   :  { %v364_v20 = vrot.slane %v182_v4, %v900_v41 }
  0xff   :  { %v185_v21 = vpop.xlane.xlu1 %184  ;;  %v365_v38 = vsel %vm248_vm4, %v364_v20, %v360_v34 }
 0x100   :  { %v191_v22 = vpop.xlane.xlu0 %190  ;;  %v369_v26 = vrot.slane %v185_v21, %v902_v42 }
 0x101   :  { %v378_v30 = vrot.slane %v191_v22, %v896_v39  ;;  %v395_v39 = vsel %vm394_vm8, %v313_v27, %v393_v35 }
 0x102   :  { %v370_v45 = vsel %vm255_vm5, %v369_v26, %v365_v38  ;;  %v397_v48 = vsel %vm396_vm9, %v332_v32, %v395_v39 }
 0x103   :  { %v197_v44 = vpop.xlane.xlu1 %196  ;;  %v379_v49 = vsel %vm241_vm3, %v378_v30, %v374_v37  ;;  %v399_v50 = vsel %vm398_vm10, %v351_v36, %v397_v48 }
 0x104   :  { %v194_v43 = vpop.xlane.xlu0 %193  ;;  %v388_v47 = vrot.slane %v197_v44, %v902_v42  ;;  %v401_v52 = vsel %vm400_vm11, %v370_v45, %v399_v50  ;;  %v501_v42 = vld [vmem:[#allocation8 + $0x10] sm:$0xff] }
 0x105   :  { %v383_v46 = vrot.slane %v194_v43, %v900_v41  ;;  %v646_v57 = vpack.c.bf16 %v502_v56, %v501_v42 }
 0x107   :  { %v384_v40 = vsel %vm248_vm4, %v383_v46, %v379_v49  ;;  %647 = vmatpush3.bf16.msra.mxu1 %v646_v57 }
 0x108   :  { %v389_v53 = vsel %vm255_vm5, %v388_v47, %v384_v40 }
 0x109   :  { %v403_v54 = vsel %vm402_vm12, %v389_v53, %v401_v52 }
 0x10a   :  { %v405_v55 = vadd.f32 %v403_v54, %v68_v51 }
 0x10c   :  { %407 = vst.msk [vmem:[#allocation2] sm:$0xff] %vm66_vm1, %v405_v55 }
 0x113   :  { %v411_v41 = vld [vmem:[#allocation2] sm:$0xff] }
 0x114   :  { %623 = vmatmul.mubr.msk.f32.vlgmr.msra.gmra.mrb[0].mxu0 %vm66_vm1, %v411_v41 }
 0x1e7   :  { %v492_v59 = vpop.f32.mrb[0].mxu0 }
 0x1e8   :  { %v493_v60 = vadd.f32 %v600_v58, %v492_v59  ;;  %v624_v61 = vpop.f32.mrb[1].mxu0 }
 0x1ea   :  { %vm496_vm13 = vcmp.ge.f32.partialorder %v493_v60, 0.0  ;;  %v497_v62 = vmul.f32 0.1, %v493_v60 }
 0x1ec   :  { %v498_v63 = vsel %vm496_vm13, %v493_v60, %v497_v62 }
 0x1ed   :  { %634 = vmatmul.mubr.msk.f32.vlgmr.msra.gmra.mrb[0].mxu1 %vm66_vm1, %v498_v63 }
 0x2c0   :  { %v579_v1 = vpop.f32.mrb[0].mxu1 }
 0x2c1   :  { %v580_v2 = vadd.f32 %v602_v0, %v579_v1  ;;  %v635_v3 = vpop.f32.mrb[1].mxu1 }
 0x2c3   :  { %583 = vst [vmem:[#allocation9] sm:$0xff] %v580_v2 }
 0x2c4   :  { %734 = shalt.err (!%p731_p0)
}
 0x2c5   :  { %s735_s12 = scalar_lea.hbm %s1008_s5, 128 }
 0x2c6   :  { %p736_p1 = scmp.ne.s32.totalorder %s1008_s5, %s735_s12  ;;  %p739_p2 = scmp.lt.u32.totalorder %s735_s12, %s1008_s5 }
 0x2c8   :  { %p741_p3 = pnand %p739_p2, %p736_p1 }
 0x2ca   :  { %744 = shalt.err (!%p741_p3)
}
 0x2cb   :  { %593 = dma.vmem_to_hbm [thread:$0]  %s591_s9, 128, %s1008_s5, [#allocation5]  }
 0x2cc   :  { %749 = dma.done.wait [#allocation5], 128  }
 0x2cd   :  { %750 = vsyncadd [#allocation5], 4294967168 }
 0x2ce   :  { %597 = vsyncpa [#allocation4], 1 }
 0x2cf   :  { %598 = vsyncpa [#allocation7], 1 }
 0x2d0   :  { %599 = vsyncpa [#allocation5], 1 }

</bundles_post_ra>
